<compile_context>
chip_gen: v7x
topology: tpu7x:2x2x1
jax: 0.10.0
libtpu: 0.0.40
codegen_flags: <defaults>
</compile_context>

<pallas_src>
import jax
import jax.numpy as jnp
from jax.experimental import pallas as pl
from jax.experimental.pallas import tpu as pltpu

LANES = 128
MAX_TILE_ROWS = 2048  # multiple of 32 -> valid for f32/bf16/int8 blocks


def _sublane_multiple(dtype) -> int:
    """Minimum sublane multiple for a given element dtype (f32->8, bf16->16, 8-bit->32)."""
    itemsize = jnp.dtype(dtype).itemsize
    return max(8, 8 * (4 // itemsize))


def _bce_tile(n_ref, x_ref, y_ref, w_ref, out_ref):
    """Compute one tile's weighted BCE-with-logits partial sums, folded to (8, 128)."""
    i = pl.program_id(0)
    tile_rows = x_ref.shape[0]

    x = x_ref[...].astype(jnp.float32)
    y = y_ref[...].astype(jnp.float32)

    # Mask elements past the true element count n (tail tile / minimal pad /
    # out-of-bounds rows of a partial block).  jnp.where is a select, so any
    # garbage (NaN/Inf) in out-of-bounds regions is dropped safely.
    row = jax.lax.broadcasted_iota(jnp.int32, (tile_rows, LANES), 0)
    lane = jax.lax.broadcasted_iota(jnp.int32, (tile_rows, LANES), 1)
    gidx = (i * tile_rows + row) * LANES + lane
    valid = gidx < n_ref[0]

    x = jnp.where(valid, x, 0.0)
    y = jnp.where(valid, y, 0.0)

    # Numerically stable BCE-with-logits:
    #   loss = max(x, 0) - x*y + log1p(exp(-|x|))
    loss = jnp.maximum(x, 0.0) - x * y + jnp.log1p(jnp.exp(-jnp.abs(x)))

    if w_ref is None:
        contrib = jnp.where(valid, loss, 0.0)
    else:
        w = jnp.where(valid, w_ref[...].astype(jnp.float32), 0.0)
        contrib = w * loss

    # Fold (tile_rows, 128) -> (8, 128) with pure VPU adds (no cross-lane XLU
    # reduce on the hot path); the tiny final reduction is done in the wrapper.
    out_ref[...] = jnp.sum(contrib.reshape(tile_rows // 8, 8, LANES), axis=0)


def _bce_kernel_weighted(n_ref, x_ref, y_ref, w_ref, out_ref):
    _bce_tile(n_ref, x_ref, y_ref, w_ref, out_ref)


def _bce_kernel_unweighted(n_ref, x_ref, y_ref, out_ref):
    _bce_tile(n_ref, x_ref, y_ref, None, out_ref)


def bce_weighted_loss(inp, target, weight=None, *, max_tile_rows=MAX_TILE_ROWS):
    """Equivalent of F.binary_cross_entropy_with_logits(inp, target, weight,
    size_average=True): mean over all elements of weight * bce(inp, target)."""
    n = int(inp.size)

    x = inp.reshape(-1)
    y = target.reshape(-1)
    operands = [x, y]
    if weight is not None:
        # TODO(synk): for small (e.g. per-channel) weights an in-kernel indexed
        # lookup would avoid this broadcast; full-shape weights (the common
        # SiamFC case) make this a no-op.
        operands.append(jnp.broadcast_to(weight, inp.shape).reshape(-1))

    # Minimal alignment pad (only when n is not a multiple of the sublane
    # chunk).  Padded elements are masked in-kernel via n, so values don't matter.
    sub = max(_sublane_multiple(a.dtype) for a in operands)
    chunk = sub * LANES
    pad = (-n) % chunk
    if pad:
        operands = [jnp.pad(a, (0, pad)) for a in operands]

    rows = (n + pad) // LANES  # multiple of `sub`
    operands = [a.reshape(rows, LANES) for a in operands]

    tile_rows = min(max_tile_rows, rows)  # both are multiples of `sub`
    grid_len = pl.cdiv(rows, tile_rows)

    in_spec = pl.BlockSpec((tile_rows, LANES), lambda i, n_ref: (i, 0))
    out_spec = pl.BlockSpec((8, LANES), lambda i, n_ref: (i, 0))

    kernel = _bce_kernel_unweighted if weight is None else _bce_kernel_weighted

    partials = pl.pallas_call(
        kernel,
        out_shape=jax.ShapeDtypeStruct((grid_len * 8, LANES), jnp.float32),
        grid_spec=pltpu.PrefetchScalarGridSpec(
            num_scalar_prefetch=1,
            grid=(grid_len,),
            in_specs=[in_spec] * len(operands),
            out_specs=out_spec,
        ),
        compiler_params=pltpu.CompilerParams(
            dimension_semantics=("parallel",)),
    )(jnp.array([n], dtype=jnp.int32), *operands)

    return jnp.sum(partials) / jnp.float32(n)


def _reference(inp, target, weight=None):
    x = inp.astype(jnp.float32)
    y = target.astype(jnp.float32)
    loss = jnp.maximum(x, 0.0) - x * y + jnp.log1p(jnp.exp(-jnp.abs(x)))
    if weight is not None:
        loss = loss * jnp.broadcast_to(weight, inp.shape).astype(jnp.float32)
    return jnp.mean(loss)


if __name__ == "__main__":
    key = jax.random.PRNGKey(0)
    k1, k2, k3, k4, k5 = jax.random.split(key, 5)

    # SiamFC-style response maps: NCHW
    N, C, H, W = 2, 4, 16, 16
    logits = jax.random.normal(k1, (N, C, H, W), dtype=jnp.float32) * 2.0
    target = (jax.random.uniform(k2, (N, C, H, W)) > 0.5).astype(jnp.float32)
    weight = jax.random.uniform(k3, (N, C, H, W), dtype=jnp.float32) + 0.5

    # unweighted case (specialized 2-input kernel)
    out0 = bce_weighted_loss(logits, target)
    jax.block_until_ready(out0)
    ref0 = _reference(logits, target)
    assert jnp.allclose(out0, ref0, rtol=1e-5, atol=1e-6), (out0, ref0)

    # weighted case
    out1 = bce_weighted_loss(logits, target, weight)
    jax.block_until_ready(out1)
    ref1 = _reference(logits, target, weight)
    assert jnp.allclose(out1, ref1, rtol=1e-5, atol=1e-6), (out1, ref1)

    # odd element count (exercises minimal pad + in-kernel tail masking)
    logits2 = jax.random.normal(k4, (3, 1, 15, 15), dtype=jnp.float32)
    target2 = (jax.random.uniform(k5, (3, 1, 15, 15)) > 0.5).astype(jnp.float32)
    out2 = bce_weighted_loss(logits2, target2)
    jax.block_until_ready(out2)
    ref2 = _reference(logits2, target2)
    assert jnp.allclose(out2, ref2, rtol=1e-5, atol=1e-6), (out2, ref2)

    # bf16 logits streamed in native dtype (cast to f32 happens in-kernel)
    logits_bf = logits.astype(jnp.bfloat16)
    out3 = bce_weighted_loss(logits_bf, target, weight)
    jax.block_until_ready(out3)
    ref3 = _reference(logits_bf, target, weight)
    assert jnp.allclose(out3, ref3, rtol=1e-4, atol=1e-6), (out3, ref3)

    print("KERNEL_OK")
</pallas_src>

<mosaic_0001>
module attributes {stable_mosaic.version = 11 : i64} {
  func.func @_bce_kernel_unweighted(%arg0: i32, %arg1: memref<1xi32, #tpu.memory_space<smem>>, %arg2: memref<16x128xf32, #tpu.memory_space<vmem>>, %arg3: memref<16x128xf32, #tpu.memory_space<vmem>>, %arg4: memref<8x128xf32, #tpu.memory_space<vmem>>) attributes {dimension_semantics = [#tpu.dimension_semantics<parallel>], iteration_bounds = array<i64: 1>, scalar_prefetch = 1 : i64, scratch_operands = 0 : i64, tpu.core_type = #tpu.core_type<tc>, window_params = [{transform_indices = @transform_0, window_bounds = array<i64: 16, 128>}, {transform_indices = @transform_1, window_bounds = array<i64: 16, 128>}, {transform_indices = @transform_2, window_bounds = array<i64: 8, 128>}]} {
    %c0 = arith.constant 0 : index
    %c0_0 = arith.constant 0 : index
    %0 = vector.load %arg2[%c0, %c0_0] : memref<16x128xf32, #tpu.memory_space<vmem>>, vector<16x128xf32>
    %c0_1 = arith.constant 0 : index
    %c0_2 = arith.constant 0 : index
    %1 = vector.load %arg3[%c0_1, %c0_2] : memref<16x128xf32, #tpu.memory_space<vmem>>, vector<16x128xf32>
    %2 = tpu.iota {dimensions = array<i32: 0>} : vector<16x128xi32>
    %3 = tpu.iota {dimensions = array<i32: 1>} : vector<16x128xi32>
    %c16_i32 = arith.constant 16 : i32
    %4 = arith.muli %arg0, %c16_i32 : i32
    %5 = vector.broadcast %4 : i32 to vector<16x128xi32>
    %6 = arith.addi %5, %2 : vector<16x128xi32>
    %c128_i32 = arith.constant 128 : i32
    %7 = vector.broadcast %c128_i32 : i32 to vector<16x128xi32>
    %8 = arith.muli %6, %7 : vector<16x128xi32>
    %9 = arith.addi %8, %3 : vector<16x128xi32>
    %c0_3 = arith.constant 0 : index
    %10 = memref.load %arg1[%c0_3] : memref<1xi32, #tpu.memory_space<smem>>
    %11 = vector.broadcast %10 : i32 to vector<16x128xi32>
    %12 = arith.cmpi slt, %9, %11 : vector<16x128xi32>
    %cst = arith.constant 0.000000e+00 : f32
    %13 = vector.broadcast %cst : f32 to vector<16x128xf32>
    %14 = arith.select %12, %0, %13 : vector<16x128xi1>, vector<16x128xf32>
    %cst_4 = arith.constant 0.000000e+00 : f32
    %15 = vector.broadcast %cst_4 : f32 to vector<16x128xf32>
    %16 = arith.select %12, %1, %15 : vector<16x128xi1>, vector<16x128xf32>
    %cst_5 = arith.constant 0.000000e+00 : f32
    %17 = vector.broadcast %cst_5 : f32 to vector<16x128xf32>
    %18 = arith.maximumf %14, %17 : vector<16x128xf32>
    %19 = arith.mulf %14, %16 : vector<16x128xf32>
    %20 = arith.subf %18, %19 : vector<16x128xf32>
    %21 = math.absf %14 : vector<16x128xf32>
    %cst_6 = arith.constant 0.000000e+00 : f32
    %22 = vector.broadcast %cst_6 : f32 to vector<16x128xf32>
    %23 = arith.subf %22, %21 : vector<16x128xf32>
    %24 = math.exp %23 : vector<16x128xf32>
    %25 = math.log1p %24 : vector<16x128xf32>
    %26 = arith.addf %20, %25 : vector<16x128xf32>
    %cst_7 = arith.constant 0.000000e+00 : f32
    %27 = vector.broadcast %cst_7 : f32 to vector<16x128xf32>
    %28 = arith.select %12, %26, %27 : vector<16x128xi1>, vector<16x128xf32>
    %29 = vector.shape_cast %28 : vector<16x128xf32> to vector<2x8x128xf32>
    %cst_8 = arith.constant dense<0.000000e+00> : vector<8x128xf32>
    %30 = vector.multi_reduction <add>, %29, %cst_8 [0] : vector<2x8x128xf32> to vector<8x128xf32>
    %c0_9 = arith.constant 0 : index
    %c0_10 = arith.constant 0 : index
    %31 = vector.load %arg4[%c0_9, %c0_10] : memref<8x128xf32, #tpu.memory_space<vmem>>, vector<8x128xf32>
    tpu.vector_store %arg4[%c0_9, %c0_10], %30 {strides = array<i32>} : memref<8x128xf32, #tpu.memory_space<vmem>>, vector<8x128xf32>,
    return
  }
  func.func @transform_0(%arg0: i32, %arg1: memref<1xi32, #tpu.memory_space<smem>>) -> (i32, i32) {
    %c0_i32 = arith.constant 0 : i32
    %c0_i32_0 = arith.constant 0 : i32
    return %arg0, %c0_i32 : i32, i32
  }
  func.func @transform_1(%arg0: i32, %arg1: memref<1xi32, #tpu.memory_space<smem>>) -> (i32, i32) {
    %c0_i32 = arith.constant 0 : i32
    %c0_i32_0 = arith.constant 0 : i32
    return %arg0, %c0_i32 : i32, i32
  }
  func.func @transform_2(%arg0: i32, %arg1: memref<1xi32, #tpu.memory_space<smem>>) -> (i32, i32) {
    %c0_i32 = arith.constant 0 : i32
    %c0_i32_0 = arith.constant 0 : i32
    return %arg0, %c0_i32 : i32, i32
  }
}

</mosaic_0001>

<bundles_post_ra>
// kernel: tpu_custom_call.1
= control target key start
LH: loop header
LB: loop body
LE: loop exit
PB: predicated region body
PF: predicated region fallthrough
CT: control target
= control target key end

     0   :  { %9 = vsyncpa [#allocation5], 0  ;;  %s290_s0 = inlined_call_operand.<no memory space> [shape: s32[1], index: 0, kind: input, shape index: {}]   ;;  %s291_s1 = inlined_call_operand.hbm [shape: f32[16,128], index: 1, kind: input, shape index: {}]   ;;  %s292_s2 = inlined_call_operand.hbm [shape: f32[16,128], index: 2, kind: input, shape index: {}]   ;;  %s293_s3 = inlined_call_operand.hbm [shape: f32[8,128], index: 3, kind: output, shape index: {}]  }
   0x1   :  { %10 = vsyncpa [#allocation8], 0 }
   0x2   :  { %11 = vsyncpa [#allocation6], 0  ;;  %s206_s12 = smov [#allocation4]   ;;  %s134_s16 = scalar_lea.hbm %s291_s1, 256 }
   0x3   :  { %s17_s13 = sshll.u32 %s206_s12, 4  ;;  %p135_p0 = scmp.ne.s32.totalorder %s291_s1, %s134_s16  ;;  %s18_s13 = int_to_ptr.vmem [resolvable:$true] %s17_s13 }
   0x4   :  { %p138_p1 = scmp.lt.u32.totalorder %s134_s16, %s291_s1 }
   0x6   :  { %p140_p2 = pnand %p138_p1, %p135_p0 }
   0x8   :  { %143 = shalt.err (!%p140_p2)
}
   0x9   :  { %s144_s21 = scalar_lea.vmem %s18_s13, 256  ;;  %p149_p4 = scmp.lt.s32.totalorder %s18_s13, %s18_s13 }
   0xa   :  { %p145_p3 = scmp.ne.s32.totalorder %s18_s13, %s144_s21  ;;  %p150_p5 = scmp.lt.s32.totalorder %s144_s21, %s144_s21 }
   0xc   :  { %p151_p6 = por %p150_p5, %p149_p4 }
   0xe   :  { %p152_p7 = pnand %p151_p6, %p145_p3 }
  0x10   :  { %155 = shalt.err (!%p152_p7)
}
  0x11   :  { %s207_s22 = smov 128   ;;  %s208_s23 = smov 8  }
  0x12   :  { %23 = dma.hbm_to_vmem [thread:$0]  %s291_s1, 256, %s18_s13, [#allocation5], %s207_s22, %s207_s22, %s208_s23  }
  0x13   :  { %s209_s26 = smov [#allocation7]   ;;  %s156_s30 = scalar_lea.hbm %s292_s2, 256 }
  0x14   :  { %s29_s27 = sshll.u32 %s209_s26, 4  ;;  %p157_p8 = scmp.ne.s32.totalorder %s292_s2, %s156_s30  ;;  %s30_s27 = int_to_ptr.vmem [resolvable:$true] %s29_s27 }
  0x15   :  { %p160_p9 = scmp.lt.u32.totalorder %s156_s30, %s292_s2 }
  0x17   :  { %p162_p10 = pnand %p160_p9, %p157_p8 }
  0x19   :  { %165 = shalt.err (!%p162_p10)
}
  0x1a   :  { %s166_s8 = scalar_lea.vmem %s30_s27, 256  ;;  %p171_p12 = scmp.lt.s32.totalorder %s30_s27, %s30_s27 }
  0x1b   :  { %p167_p11 = scmp.ne.s32.totalorder %s30_s27, %s166_s8  ;;  %p172_p13 = scmp.lt.s32.totalorder %s166_s8, %s166_s8 }
  0x1d   :  { %p173_p0 = por %p172_p13, %p171_p12 }
  0x1f   :  { %p174_p1 = pnand %p173_p0, %p167_p11 }
  0x21   :  { %177 = shalt.err (!%p174_p1)
}
  0x22   :  { %35 = dma.hbm_to_vmem [thread:$0]  %s292_s2, 256, %s30_s27, [#allocation8], %s207_s22, %s207_s22, %s208_s23  }
  0x23   :  { %200 = dma.done.wait [#allocation5], 256  }
  0x24   :  { %201 = vsyncadd [#allocation5], 4294967040 }
  0x25   :  { %202 = dma.done.wait [#allocation8], 256  }
  0x26   :  { %203 = vsyncadd [#allocation8], 4294967040  ;;  %v46_v0 = vlaneseq  ;;  %v60_v5 = vstv %s290_s0  ;;  %v42_v8 = vld [vmem:[#allocation4] sm:$0xff]  ;;  %v43_v9 = vld [vmem:[#allocation4 + $0x8] sm:$0xff]  ;;  %s210_s0 = smov [#allocation9]  }
  0x27   :  { %v44_v25 = vld [vmem:[#allocation7] sm:$0xff]  ;;  %v45_v26 = vld [vmem:[#allocation7 + $0x8] sm:$0xff]  ;;  %s111_s2 = sshll.u32 %s210_s0, 4  ;;  %s112_s2 = int_to_ptr.vmem [resolvable:$true] %s111_s2 }
  0x28   :  { %v47_v1 = vshrl.u32 %v46_v0, 7  ;;  %v50_v2 = vand.u32 127, %v46_v0  ;;  %s178_s12 = scalar_lea.vmem %s112_s2, 128  ;;  %p183_p3 = scmp.lt.s32.totalorder %s112_s2, %s112_s2 }
  0x29   :  { %p179_p2 = scmp.ne.s32.totalorder %s112_s2, %s178_s12  ;;  %p184_p4 = scmp.lt.s32.totalorder %s178_s12, %s178_s12 }
  0x2a   :  { %v48_v3 = vadd.s32 8, %v47_v1  ;;  %v55_v4 = vmul.u32 128, %v47_v1 }
  0x2b   :  { %p185_p5 = por %p184_p4, %p183_p3 }
  0x2c   :  { %v56_v6 = vmul.u32 128, %v48_v3  ;;  %v57_v7 = vadd.s32 %v55_v4, %v50_v2 }
  0x2d   :  { %p186_p6 = pnand %p185_p5, %p179_p2 }
  0x2e   :  { %v58_v10 = vadd.s32 %v56_v6, %v50_v2  ;;  %vm258_vm0 = vcmp.lt.s32.totalorder %v57_v7, %v60_v5 }
  0x2f   :  { %v63_v12 = vsel %vm258_vm0, %v42_v8, 0.0  ;;  %v65_v29 = vsel %vm258_vm0, %v44_v25, 0.0 }
  0x30   :  { %vm264_vm1 = vcmp.lt.s32.totalorder %v58_v10, %v60_v5  ;;  %v73_v14 = vand.u32 2147483647, %v63_v12  ;;  %v67_v32 = vmax.f32 %v63_v12, 0.0  ;;  %v69_v33 = vmul.f32 %v65_v29, %v63_v12 }
  0x31   :  { %v64_v15 = vsel %vm264_vm1, %v43_v9, 0.0  ;;  %v66_v30 = vsel %vm264_vm1, %v45_v26, 0.0 }
  0x32   :  { %v74_v16 = vand.u32 2147483647, %v64_v15  ;;  %v75_v17 = vsub.f32 0.0, %v73_v14  ;;  %v68_v36 = vmax.f32 %v64_v15, 0.0  ;;  %v70_v37 = vmul.f32 %v66_v30, %v64_v15 }
  0x33   :  { %v71_v41 = vsub.f32 %v67_v32, %v69_v33 }
  0x34   :  { %v76_v18 = vsub.f32 0.0, %v74_v16  ;;  %v77_v19 = vmul.f32 1.442695, %v75_v17  ;;  %v72_v44 = vsub.f32 %v68_v36, %v70_v37 }
  0x36   :  { %v79_v20 = vmul.f32 1.442695, %v76_v18  ;;  %126 = vpow2.f32 %v77_v19 }
  0x38   :  { %128 = vpow2.f32 %v79_v20 }
  0x40   :  { %v127_v21 = vpop.eup %126 }
  0x41   :  { %v81_v23 = vadd.f32 1.0, %v127_v21  ;;  %v84_v27 = vmul.f32 -0.5, %v127_v21  ;;  %v87_v34 = vand.u32 2147483647, %v127_v21 }
  0x42   :  { %v129_v22 = vpop.eup %128 }
  0x43   :  { %v90_v24 = vadd.f32 1.0, %v129_v22  ;;  %130 = vlog2.f32 %v81_v23  ;;  %v93_v28 = vmul.f32 -0.5, %v129_v22  ;;  %v85_v31 = vadd.f32 1.0, %v84_v27 }
  0x44   :  { %v96_v38 = vand.u32 2147483647, %v129_v22  ;;  %vm88_vm2 = vcmp.lt.f32.partialorder %v87_v34, 0.0004427343 }
  0x45   :  { %132 = vlog2.f32 %v90_v24  ;;  %v94_v35 = vadd.f32 1.0, %v93_v28  ;;  %v86_v39 = vmul.f32 %v127_v21, %v85_v31 }
  0x46   :  { %vm97_vm3 = vcmp.lt.f32.partialorder %v96_v38, 0.0004427343 }
  0x47   :  { %v95_v42 = vmul.f32 %v129_v22, %v94_v35 }
  0x4d   :  { %v131_v40 = vpop.eup %130 }
  0x4e   :  { %v83_v45 = vmul.f32 0.6931472, %v131_v40 }
  0x4f   :  { %v133_v43 = vpop.eup %132 }
  0x50   :  { %v92_v46 = vmul.f32 0.6931472, %v133_v43  ;;  %v89_v47 = vsel %vm88_vm2, %v86_v39, %v83_v45 }
  0x51   :  { %v99_v49 = vadd.f32 %v89_v47, %v71_v41 }
  0x52   :  { %v98_v48 = vsel %vm97_vm3, %v95_v42, %v92_v46 }
  0x53   :  { %v100_v50 = vadd.f32 %v98_v48, %v72_v44  ;;  %v101_v51 = vsel %vm258_vm0, %v99_v49, 0.0 }
  0x55   :  { %v102_v52 = vsel %vm264_vm1, %v100_v50, 0.0 }
  0x56   :  { %v103_v53 = vadd.f32 %v102_v52, %v101_v51 }
  0x58   :  { %104 = vst [vmem:[#allocation9] sm:$0xff] %v103_v53 }
  0x59   :  { %189 = shalt.err (!%p186_p6)
}
  0x5a   :  { %s190_s15 = scalar_lea.hbm %s293_s3, 128 }
  0x5b   :  { %p191_p7 = scmp.ne.s32.totalorder %s293_s3, %s190_s15  ;;  %p194_p8 = scmp.lt.u32.totalorder %s190_s15, %s293_s3 }
  0x5d   :  { %p196_p9 = pnand %p194_p8, %p191_p7 }
  0x5f   :  { %199 = shalt.err (!%p196_p9)
}
  0x60   :  { %114 = dma.vmem_to_hbm [thread:$0]  %s112_s2, 128, %s293_s3, [#allocation6]  }
  0x61   :  { %204 = dma.done.wait [#allocation6], 128  }
  0x62   :  { %205 = vsyncadd [#allocation6], 4294967168 }
  0x63   :  { %118 = vsyncpa [#allocation5], 1 }
  0x64   :  { %119 = vsyncpa [#allocation8], 1 }
  0x65   :  { %120 = vsyncpa [#allocation6], 1 }

</bundles_post_ra>
